<compile_context>
chip_gen: v6e
topology: v6e:2x2x1
jax: 0.10.0
libtpu: 0.0.40
codegen_flags: <defaults>
</compile_context>

<pallas_src>
import jax
import jax.numpy as jnp
from jax.experimental import pallas as pl
from jax.experimental.pallas import tpu as pltpu

LANE = 128
SUBLANE = 8


def _round_up(x, m):
    return (x + m - 1) // m * m


# ----------------------------------------------------------------------------- kernel
def _qnet_step_kernel(x_ref, h0_ref,
                      w_in_ref, b_in_ref,
                      w_g_ref, b_g_ref,
                      w_out_ref, b_out_ref,
                      out_ref, hseq_ref,
                      u_state):
    """One GRU-cell step per grid point; [a|h] carried in VMEM scratch across t."""
    MP = w_in_ref.shape[-1]          # padded MLP width (128-lane multiple)
    HP = hseq_ref.shape[-1]          # padded hidden width (128-lane multiple)
    t = pl.program_id(1)

    # Load the initial hidden state into the tail of the fused-input scratch
    # once per batch tile (t == 0).
    @pl.when(t == 0)
    def _():
        u_state[:, MP:] = h0_ref[...].astype(jnp.float32)

    wdt = w_in_ref.dtype
    x = x_ref[...]                   # (Bt, KP) lane-dense
    h = u_state[:, MP:]              # (Bt, HP) f32 carry (previous step / h0)

    # ---- mlp_in_layer + ReLU; result written into the `a` half of u ----
    a = jnp.dot(x.astype(wdt), w_in_ref[...],
                preferred_element_type=jnp.float32) + b_in_ref[...].astype(jnp.float32)
    u_state[:, :MP] = jnp.maximum(a, 0.0)

    # ---- GRUCell: single fused MXU matmul on u = [a | h] against packed gates ----
    g = jnp.dot(u_state[...].astype(wdt), w_g_ref[...],
                preferred_element_type=jnp.float32) + b_g_ref[...].astype(jnp.float32)
    # gate blocks are 128-lane aligned -> free slices
    r = jax.nn.sigmoid(g[:, 0:HP])
    z = jax.nn.sigmoid(g[:, HP:2 * HP])
    n = jnp.tanh(g[:, 2 * HP:3 * HP] + r * g[:, 3 * HP:4 * HP])
    h_new = (1.0 - z) * n + z * h    # (Bt, HP); padded lanes stay exactly 0

    # ---- mlp_out_layer (lane-dense padded output) ----
    out = jnp.dot(h_new.astype(wdt), w_out_ref[...],
                  preferred_element_type=jnp.float32) + b_out_ref[...].astype(jnp.float32)

    # carry + per-step outputs
    u_state[:, MP:] = h_new
    out_ref[...] = out.astype(out_ref.dtype)
    hseq_ref[...] = h_new.astype(hseq_ref.dtype)


# ----------------------------------------------------------------------------- wrappers
def _rollout_padded(x_seq, h0, kp, *, b_tile=None):
    """x_seq: (T, B, obs+act) f32; h0: (B, H) f32. Returns padded (T,Bp,AP), (T,Bp,HP)."""
    T, B, K0 = x_seq.shape
    KP = kp["w_in"].shape[0]
    MP = kp["w_in"].shape[-1]
    HP = kp["w_g"].shape[-1] // 4
    AP = kp["w_out"].shape[-1]

    # Batch tiling: pad batch to a sublane multiple; large batches pipeline in tiles.
    if b_tile is None:
        b_tile = 512 if B >= 512 else _round_up(B, SUBLANE)
    b_tile = _round_up(b_tile, SUBLANE)
    Bp = _round_up(B, b_tile)
    nb = Bp // b_tile

    # Lane-dense input: zero-pad features to KP and batch to Bp.
    x_p = jnp.zeros((T, Bp, KP), jnp.float32)
    x_p = x_p.at[:, :B, :K0].set(x_seq.astype(jnp.float32))
    # Zero-pad the hidden state to HP lanes (padded lanes remain zero across steps).
    h0_p = jnp.zeros((Bp, HP), jnp.float32)
    h0_p = h0_p.at[:B, :h0.shape[-1]].set(h0.astype(jnp.float32))

    in_specs = [
        pl.BlockSpec((None, b_tile, KP), lambda b, t: (t, b, 0)),   # x_seq, new tile each t
        pl.BlockSpec((b_tile, HP),       lambda b, t: (b, 0)),      # h0 (read at t==0)
        # weights/biases: constant block index -> fetched once, stay VMEM-resident
        pl.BlockSpec(kp["w_in"].shape,   lambda b, t: (0, 0)),
        pl.BlockSpec(kp["b_in"].shape,   lambda b, t: (0, 0)),
        pl.BlockSpec(kp["w_g"].shape,    lambda b, t: (0, 0)),
        pl.BlockSpec(kp["b_g"].shape,    lambda b, t: (0, 0)),
        pl.BlockSpec(kp["w_out"].shape,  lambda b, t: (0, 0)),
        pl.BlockSpec(kp["b_out"].shape,  lambda b, t: (0, 0)),
    ]
    out_specs = (
        pl.BlockSpec((None, b_tile, AP), lambda b, t: (t, b, 0)),   # per-step Q values
        pl.BlockSpec((None, b_tile, HP), lambda b, t: (t, b, 0)),   # per-step hidden
    )
    out_shape = (
        jax.ShapeDtypeStruct((T, Bp, AP), jnp.float32),
        jax.ShapeDtypeStruct((T, Bp, HP), jnp.float32),
    )

    bytes_per_elt = 4
    flops = int(2 * T * Bp * (KP * MP + (MP + HP) * 4 * HP + HP * AP))
    trans = int(3 * T * Bp * HP)
    bytes_acc = int((x_p.size + h0_p.size + sum(int(v.size) for v in kp.values())
                     + T * Bp * (AP + HP)) * bytes_per_elt)

    out_p, h_p = pl.pallas_call(
        _qnet_step_kernel,
        grid=(nb, T),
        in_specs=in_specs,
        out_specs=out_specs,
        out_shape=out_shape,
        scratch_shapes=[pltpu.VMEM((b_tile, MP + HP), jnp.float32)],  # fused [a|h] carry
        compiler_params=pltpu.CompilerParams(
            dimension_semantics=("parallel", "arbitrary")),
        cost_estimate=pl.CostEstimate(flops=flops, transcendentals=trans,
                                      bytes_accessed=bytes_acc),
    )(x_p, h0_p, kp["w_in"], kp["b_in"], kp["w_g"], kp["b_g"],
      kp["w_out"], kp["b_out"])
    return out_p, h_p


def q_network_rollout(x_seq, h0, kp, act_size, hidden_size, *, b_tile=None):
    """Fused T-step rollout. Returns (T,B,act_size) Q-values and (T,B,H) hiddens."""
    B = x_seq.shape[1]
    out_p, h_p = _rollout_padded(x_seq, h0, kp, b_tile=b_tile)
    return out_p[:, :B, :act_size], h_p[:, :B, :hidden_size]


def q_network_forward(obs_a_cat, hidden_last, kp, act_size, hidden_size):
    """Single step == the PyTorch module's forward(obs_a_cat, hidden_last)."""
    out_seq, h_seq = q_network_rollout(obs_a_cat[None], hidden_last, kp,
                                       act_size, hidden_size)
    return out_seq[0], h_seq[0]


# ----------------------------------------------------------------------------- params
def make_params(key, obs_size, act_size, q_net_out0, hidden_size):
    """Synthetic params in transposed (in,out) layout, matching the PyTorch module."""
    ks = jax.random.split(key, 8)
    s = 0.1
    H = hidden_size
    w_in = s * jax.random.normal(ks[0], (obs_size + act_size, q_net_out0), jnp.float32)
    b_in = s * jax.random.normal(ks[1], (1, q_net_out0), jnp.float32)
    w_ih = s * jax.random.normal(ks[2], (q_net_out0, 3 * H), jnp.float32)   # [r|z|n]
    b_ih = s * jax.random.normal(ks[3], (1, 3 * H), jnp.float32)
    w_hh = s * jax.random.normal(ks[4], (H, 3 * H), jnp.float32)
    b_hh = s * jax.random.normal(ks[5], (1, 3 * H), jnp.float32)
    w_out = s * jax.random.normal(ks[6], (H, act_size), jnp.float32)
    b_out = s * jax.random.normal(ks[7], (1, act_size), jnp.float32)
    return dict(w_in=w_in, b_in=b_in, w_ih=w_ih, b_ih=b_ih,
                w_hh=w_hh, b_hh=b_hh, w_out=w_out, b_out=b_out)


def pack_params(p, hidden_size, dtype=jnp.float32):
    """Pack/zero-pad params for the kernel. Use dtype=jnp.bfloat16 on v6e/v7x."""
    K0, M0 = p["w_in"].shape
    H = hidden_size
    A = p["w_out"].shape[-1]
    KP, MP = _round_up(K0, LANE), _round_up(M0, LANE)
    HP, AP = _round_up(H, LANE), _round_up(A, LANE)

    w_in = jnp.zeros((KP, MP), dtype).at[:K0, :M0].set(p["w_in"].astype(dtype))
    b_in = jnp.zeros((1, MP), dtype).at[0, :M0].set(p["b_in"].reshape(-1).astype(dtype))

    w_ih, w_hh = p["w_ih"].astype(dtype), p["w_hh"].astype(dtype)
    b_ih, b_hh = p["b_ih"].reshape(-1).astype(dtype), p["b_hh"].reshape(-1).astype(dtype)

    # Packed gate weight: rows [0:MP)=a path, [MP:MP+HP)=h path;
    # column blocks (each HP lanes): [ r | z | i_n | h_n ].
    w_g = jnp.zeros((MP + HP, 4 * HP), dtype)
    b_g = jnp.zeros((1, 4 * HP), dtype)
    # r
    w_g = w_g.at[:M0, 0:H].set(w_ih[:, 0:H])
    w_g = w_g.at[MP:MP + H, 0:H].set(w_hh[:, 0:H])
    b_g = b_g.at[0, 0:H].set(b_ih[0:H] + b_hh[0:H])
    # z
    w_g = w_g.at[:M0, HP:HP + H].set(w_ih[:, H:2 * H])
    w_g = w_g.at[MP:MP + H, HP:HP + H].set(w_hh[:, H:2 * H])
    b_g = b_g.at[0, HP:HP + H].set(b_ih[H:2 * H] + b_hh[H:2 * H])
    # i_n (input path only)
    w_g = w_g.at[:M0, 2 * HP:2 * HP + H].set(w_ih[:, 2 * H:3 * H])
    b_g = b_g.at[0, 2 * HP:2 * HP + H].set(b_ih[2 * H:3 * H])
    # h_n (hidden path only; bias kept here so it lands inside r*(...))
    w_g = w_g.at[MP:MP + H, 3 * HP:3 * HP + H].set(w_hh[:, 2 * H:3 * H])
    b_g = b_g.at[0, 3 * HP:3 * HP + H].set(b_hh[2 * H:3 * H])

    w_out = jnp.zeros((HP, AP), dtype).at[:H, :A].set(p["w_out"].astype(dtype))
    b_out = jnp.zeros((1, AP), dtype).at[0, :A].set(p["b_out"].reshape(-1).astype(dtype))

    return dict(w_in=w_in, b_in=b_in, w_g=w_g, b_g=b_g, w_out=w_out, b_out=b_out)


# ----------------------------------------------------------------------------- reference
def _reference_forward(x, h, p):
    """Pure-JAX single step mirroring the PyTorch module semantics."""
    a = jnp.maximum(x @ p["w_in"] + p["b_in"], 0.0)
    gi = a @ p["w_ih"] + p["b_ih"]
    gh = h @ p["w_hh"] + p["b_hh"]
    H = h.shape[-1]
    r = jax.nn.sigmoid(gi[:, :H] + gh[:, :H])
    z = jax.nn.sigmoid(gi[:, H:2 * H] + gh[:, H:2 * H])
    n = jnp.tanh(gi[:, 2 * H:] + r * gh[:, 2 * H:])
    h_new = (1.0 - z) * n + z * h
    return h_new @ p["w_out"] + p["b_out"], h_new


if __name__ == "__main__":
    obs_size, act_size = 24, 8
    q_net_out0, hidden_size = 32, 32
    batch, T = 8, 6

    key = jax.random.PRNGKey(0)
    k_x, k_h, k_p = jax.random.split(key, 3)

    x_seq = jax.random.normal(k_x, (T, batch, obs_size + act_size), jnp.float32)
    h0 = jax.random.normal(k_h, (batch, hidden_size), jnp.float32)
    params = make_params(k_p, obs_size, act_size, q_net_out0, hidden_size)
    # f32 here for a tight numerical check; pass dtype=jnp.bfloat16 for v6e/v7x MXU path.
    kp = pack_params(params, hidden_size, dtype=jnp.float32)

    # --- single step (exactly the PyTorch module forward) ---
    out1, h1 = q_network_forward(x_seq[0], h0, kp, act_size, hidden_size)
    jax.block_until_ready((out1, h1))
    ref_out1, ref_h1 = _reference_forward(x_seq[0], h0, params)
    assert jnp.allclose(out1, ref_out1, atol=2e-4, rtol=2e-4), "single-step output mismatch"
    assert jnp.allclose(h1, ref_h1, atol=2e-4, rtol=2e-4), "single-step hidden mismatch"

    # --- fused T-step rollout (time loop inside the kernel) ---
    outs, hs = q_network_rollout(x_seq, h0, kp, act_size, hidden_size)
    jax.block_until_ready((outs, hs))
    ref_outs, ref_hs, h = [], [], h0
    for t in range(T):
        o, h = _reference_forward(x_seq[t], h, params)
        ref_outs.append(o)
        ref_hs.append(h)
    ref_outs = jnp.stack(ref_outs)
    ref_hs = jnp.stack(ref_hs)
    assert jnp.allclose(outs, ref_outs, atol=2e-4, rtol=2e-4), "rollout output mismatch"
    assert jnp.allclose(hs, ref_hs, atol=2e-4, rtol=2e-4), "rollout hidden mismatch"

    print("KERNEL_OK")
</pallas_src>

<mosaic_0001>
module attributes {stable_mosaic.version = 11 : i64} {
  func.func @_qnet_step_kernel(%arg0: i32, %arg1: i32, %arg2: memref<1x8x128xf32, #tpu.memory_space<vmem>>, %arg3: memref<8x128xf32, #tpu.memory_space<vmem>>, %arg4: memref<128x128xf32, #tpu.memory_space<vmem>>, %arg5: memref<1x128xf32, #tpu.memory_space<vmem>>, %arg6: memref<256x512xf32, #tpu.memory_space<vmem>>, %arg7: memref<1x512xf32, #tpu.memory_space<vmem>>, %arg8: memref<128x128xf32, #tpu.memory_space<vmem>>, %arg9: memref<1x128xf32, #tpu.memory_space<vmem>>, %arg10: memref<1x8x128xf32, #tpu.memory_space<vmem>>, %arg11: memref<1x8x128xf32, #tpu.memory_space<vmem>>, %arg12: memref<8x256xf32, #tpu.memory_space<vmem>>) attributes {dimension_semantics = [#tpu.dimension_semantics<parallel>, #tpu.dimension_semantics<arbitrary>], iteration_bounds = array<i64: 1, 1>, scalar_prefetch = 0 : i64, scratch_operands = 1 : i64, tpu.core_type = #tpu.core_type<tc>, window_params = [{transform_indices = @transform_0, window_bounds = array<i64: 1, 8, 128>}, {transform_indices = @transform_1, window_bounds = array<i64: 8, 128>}, {pipeline_mode = #tpu.pipeline_mode<synchronous>, transform_indices = @transform_2, window_bounds = array<i64: 128, 128>}, {pipeline_mode = #tpu.pipeline_mode<synchronous>, transform_indices = @transform_3, window_bounds = array<i64: 1, 128>}, {pipeline_mode = #tpu.pipeline_mode<synchronous>, transform_indices = @transform_4, window_bounds = array<i64: 256, 512>}, {pipeline_mode = #tpu.pipeline_mode<synchronous>, transform_indices = @transform_5, window_bounds = array<i64: 1, 512>}, {pipeline_mode = #tpu.pipeline_mode<synchronous>, transform_indices = @transform_6, window_bounds = array<i64: 128, 128>}, {pipeline_mode = #tpu.pipeline_mode<synchronous>, transform_indices = @transform_7, window_bounds = array<i64: 1, 128>}, {transform_indices = @transform_8, window_bounds = array<i64: 1, 8, 128>}, {transform_indices = @transform_9, window_bounds = array<i64: 1, 8, 128>}]} {
    %c0_i32 = arith.constant 0 : i32
    %0 = arith.cmpi eq, %arg1, %c0_i32 : i32
    %1 = arith.extui %0 : i1 to i32
    %c0_i32_0 = arith.constant 0 : i32
    %2 = arith.cmpi ne, %1, %c0_i32_0 : i32
    scf.if %2 {
      %c0_34 = arith.constant 0 : index
      %c0_35 = arith.constant 0 : index
      %54 = vector.load %arg3[%c0_34, %c0_35] : memref<8x128xf32, #tpu.memory_space<vmem>>, vector<8x128xf32>
      %c0_36 = arith.constant 0 : index
      %c128_37 = arith.constant 128 : index
      %55 = vector.load %arg12[%c0_36, %c128_37] : memref<8x256xf32, #tpu.memory_space<vmem>>, vector<8x128xf32>
      tpu.vector_store %arg12[%c0_36, %c128_37], %54 {strides = array<i32>} : memref<8x256xf32, #tpu.memory_space<vmem>>, vector<8x128xf32>,
    } else {
    }
    %c0 = arith.constant 0 : index
    %c0_1 = arith.constant 0 : index
    %c0_2 = arith.constant 0 : index
    %3 = vector.load %arg2[%c0, %c0_1, %c0_2] : memref<1x8x128xf32, #tpu.memory_space<vmem>>, vector<1x8x128xf32>
    %4 = vector.shape_cast %3 : vector<1x8x128xf32> to vector<8x128xf32>
    %c0_3 = arith.constant 0 : index
    %c128 = arith.constant 128 : index
    %5 = vector.load %arg12[%c0_3, %c128] : memref<8x256xf32, #tpu.memory_space<vmem>>, vector<8x128xf32>
    %c0_4 = arith.constant 0 : index
    %c0_5 = arith.constant 0 : index
    %6 = vector.load %arg4[%c0_4, %c0_5] : memref<128x128xf32, #tpu.memory_space<vmem>>, vector<128x128xf32>
    %cst = arith.constant dense<0.000000e+00> : vector<8x128xf32>
    %7 = tpu.matmul %4, %6, %cst {dimension_numbers = #tpu.dot_dimension_numbers<[1], [0], [0], [1], [0, 0, 1, 1], [], []>} : vector<8x128xf32>, vector<128x128xf32>, vector<8x128xf32> -> vector<8x128xf32>
    %c0_6 = arith.constant 0 : index
    %c0_7 = arith.constant 0 : index
    %8 = vector.load %arg5[%c0_6, %c0_7] : memref<1x128xf32, #tpu.memory_space<vmem>>, vector<1x128xf32>
    %9 = vector.broadcast %8 : vector<1x128xf32> to vector<8x128xf32>
    %10 = arith.addf %7, %9 : vector<8x128xf32>
    %cst_8 = arith.constant 0.000000e+00 : f32
    %11 = vector.broadcast %cst_8 : f32 to vector<8x128xf32>
    %12 = arith.maximumf %10, %11 : vector<8x128xf32>
    %c0_9 = arith.constant 0 : index
    %c0_10 = arith.constant 0 : index
    %13 = vector.load %arg12[%c0_9, %c0_10] : memref<8x256xf32, #tpu.memory_space<vmem>>, vector<8x128xf32>
    tpu.vector_store %arg12[%c0_9, %c0_10], %12 {strides = array<i32>} : memref<8x256xf32, #tpu.memory_space<vmem>>, vector<8x128xf32>,
    %c0_11 = arith.constant 0 : index
    %c0_12 = arith.constant 0 : index
    %14 = vector.load %arg12[%c0_11, %c0_12] : memref<8x256xf32, #tpu.memory_space<vmem>>, vector<8x256xf32>
    %c0_13 = arith.constant 0 : index
    %c0_14 = arith.constant 0 : index
    %15 = vector.load %arg6[%c0_13, %c0_14] : memref<256x512xf32, #tpu.memory_space<vmem>>, vector<256x512xf32>
    %cst_15 = arith.constant dense<0.000000e+00> : vector<8x512xf32>
    %16 = tpu.matmul %14, %15, %cst_15 {dimension_numbers = #tpu.dot_dimension_numbers<[1], [0], [0], [1], [0, 0, 1, 1], [], []>} : vector<8x256xf32>, vector<256x512xf32>, vector<8x512xf32> -> vector<8x512xf32>
    %c0_16 = arith.constant 0 : index
    %c0_17 = arith.constant 0 : index
    %17 = vector.load %arg7[%c0_16, %c0_17] : memref<1x512xf32, #tpu.memory_space<vmem>>, vector<1x512xf32>
    %18 = vector.broadcast %17 : vector<1x512xf32> to vector<8x512xf32>
    %19 = arith.addf %16, %18 : vector<8x512xf32>
    %20 = vector.extract_strided_slice %19 {offsets = [0, 0], sizes = [8, 128], strides = [1, 1]} : vector<8x512xf32> to vector<8x128xf32>
    %21 = arith.negf %20 : vector<8x128xf32>
    %22 = math.exp %21 : vector<8x128xf32>
    %cst_18 = arith.constant 1.000000e+00 : f32
    %23 = vector.broadcast %cst_18 : f32 to vector<8x128xf32>
    %24 = arith.addf %23, %22 : vector<8x128xf32>
    %25 = arith.divf %23, %24 : vector<8x128xf32>
    %26 = vector.extract_strided_slice %19 {offsets = [0, 128], sizes = [8, 128], strides = [1, 1]} : vector<8x512xf32> to vector<8x128xf32>
    %27 = arith.negf %26 : vector<8x128xf32>
    %28 = math.exp %27 : vector<8x128xf32>
    %cst_19 = arith.constant 1.000000e+00 : f32
    %29 = vector.broadcast %cst_19 : f32 to vector<8x128xf32>
    %30 = arith.addf %29, %28 : vector<8x128xf32>
    %31 = arith.divf %29, %30 : vector<8x128xf32>
    %32 = vector.extract_strided_slice %19 {offsets = [0, 256], sizes = [8, 128], strides = [1, 1]} : vector<8x512xf32> to vector<8x128xf32>
    %33 = vector.extract_strided_slice %19 {offsets = [0, 384], sizes = [8, 128], strides = [1, 1]} : vector<8x512xf32> to vector<8x128xf32>
    %34 = arith.mulf %25, %33 : vector<8x128xf32>
    %35 = arith.addf %32, %34 : vector<8x128xf32>
    %36 = math.tanh %35 : vector<8x128xf32>
    %cst_20 = arith.constant 1.000000e+00 : f32
    %37 = vector.broadcast %cst_20 : f32 to vector<8x128xf32>
    %38 = arith.subf %37, %31 : vector<8x128xf32>
    %39 = arith.mulf %38, %36 : vector<8x128xf32>
    %40 = arith.mulf %31, %5 : vector<8x128xf32>
    %41 = arith.addf %39, %40 : vector<8x128xf32>
    %c0_21 = arith.constant 0 : index
    %c0_22 = arith.constant 0 : index
    %42 = vector.load %arg8[%c0_21, %c0_22] : memref<128x128xf32, #tpu.memory_space<vmem>>, vector<128x128xf32>
    %cst_23 = arith.constant dense<0.000000e+00> : vector<8x128xf32>
    %43 = tpu.matmul %41, %42, %cst_23 {dimension_numbers = #tpu.dot_dimension_numbers<[1], [0], [0], [1], [0, 0, 1, 1], [], []>} : vector<8x128xf32>, vector<128x128xf32>, vector<8x128xf32> -> vector<8x128xf32>
    %c0_24 = arith.constant 0 : index
    %c0_25 = arith.constant 0 : index
    %44 = vector.load %arg9[%c0_24, %c0_25] : memref<1x128xf32, #tpu.memory_space<vmem>>, vector<1x128xf32>
    %45 = vector.broadcast %44 : vector<1x128xf32> to vector<8x128xf32>
    %46 = arith.addf %43, %45 : vector<8x128xf32>
    %c0_26 = arith.constant 0 : index
    %c128_27 = arith.constant 128 : index
    %47 = vector.load %arg12[%c0_26, %c128_27] : memref<8x256xf32, #tpu.memory_space<vmem>>, vector<8x128xf32>
    tpu.vector_store %arg12[%c0_26, %c128_27], %41 {strides = array<i32>} : memref<8x256xf32, #tpu.memory_space<vmem>>, vector<8x128xf32>,
    %c0_28 = arith.constant 0 : index
    %c0_29 = arith.constant 0 : index
    %c0_30 = arith.constant 0 : index
    %48 = vector.load %arg10[%c0_28, %c0_29, %c0_30] : memref<1x8x128xf32, #tpu.memory_space<vmem>>, vector<1x8x128xf32>
    %49 = vector.shape_cast %48 : vector<1x8x128xf32> to vector<8x128xf32>
    %50 = vector.shape_cast %46 : vector<8x128xf32> to vector<1x8x128xf32>
    tpu.vector_store %arg10[%c0_28, %c0_29, %c0_30], %50 {strides = array<i32>} : memref<1x8x128xf32, #tpu.memory_space<vmem>>, vector<1x8x128xf32>,
    %c0_31 = arith.constant 0 : index
    %c0_32 = arith.constant 0 : index
    %c0_33 = arith.constant 0 : index
    %51 = vector.load %arg11[%c0_31, %c0_32, %c0_33] : memref<1x8x128xf32, #tpu.memory_space<vmem>>, vector<1x8x128xf32>
    %52 = vector.shape_cast %51 : vector<1x8x128xf32> to vector<8x128xf32>
    %53 = vector.shape_cast %41 : vector<8x128xf32> to vector<1x8x128xf32>
    tpu.vector_store %arg11[%c0_31, %c0_32, %c0_33], %53 {strides = array<i32>} : memref<1x8x128xf32, #tpu.memory_space<vmem>>, vector<1x8x128xf32>,
    return
  }
  func.func @transform_0(%arg0: i32, %arg1: i32) -> (i32, i32, i32) {
    %c0_i32 = arith.constant 0 : i32
    %c0_i32_0 = arith.constant 0 : i32
    return %arg1, %arg0, %c0_i32 : i32, i32, i32
  }
  func.func @transform_1(%arg0: i32, %arg1: i32) -> (i32, i32) {
    %c0_i32 = arith.constant 0 : i32
    %c0_i32_0 = arith.constant 0 : i32
    return %arg0, %c0_i32 : i32, i32
  }
  func.func @transform_2(%arg0: i32, %arg1: i32) -> (i32, i32) {
    %c0_i32 = arith.constant 0 : i32
    %c0_i32_0 = arith.constant 0 : i32
    %c0_i32_1 = arith.constant 0 : i32
    return %c0_i32, %c0_i32_0 : i32, i32
  }
  func.func @transform_3(%arg0: i32, %arg1: i32) -> (i32, i32) {
    %c0_i32 = arith.constant 0 : i32
    %c0_i32_0 = arith.constant 0 : i32
    %c0_i32_1 = arith.constant 0 : i32
    return %c0_i32, %c0_i32_0 : i32, i32
  }
  func.func @transform_4(%arg0: i32, %arg1: i32) -> (i32, i32) {
    %c0_i32 = arith.constant 0 : i32
    %c0_i32_0 = arith.constant 0 : i32
    %c0_i32_1 = arith.constant 0 : i32
    return %c0_i32, %c0_i32_0 : i32, i32
  }
  func.func @transform_5(%arg0: i32, %arg1: i32) -> (i32, i32) {
    %c0_i32 = arith.constant 0 : i32
    %c0_i32_0 = arith.constant 0 : i32
    %c0_i32_1 = arith.constant 0 : i32
    return %c0_i32, %c0_i32_0 : i32, i32
  }
  func.func @transform_6(%arg0: i32, %arg1: i32) -> (i32, i32) {
    %c0_i32 = arith.constant 0 : i32
    %c0_i32_0 = arith.constant 0 : i32
    %c0_i32_1 = arith.constant 0 : i32
    return %c0_i32, %c0_i32_0 : i32, i32
  }
  func.func @transform_7(%arg0: i32, %arg1: i32) -> (i32, i32) {
    %c0_i32 = arith.constant 0 : i32
    %c0_i32_0 = arith.constant 0 : i32
    %c0_i32_1 = arith.constant 0 : i32
    return %c0_i32, %c0_i32_0 : i32, i32
  }
  func.func @transform_8(%arg0: i32, %arg1: i32) -> (i32, i32, i32) {
    %c0_i32 = arith.constant 0 : i32
    %c0_i32_0 = arith.constant 0 : i32
    return %arg1, %arg0, %c0_i32 : i32, i32, i32
  }
  func.func @transform_9(%arg0: i32, %arg1: i32) -> (i32, i32, i32) {
    %c0_i32 = arith.constant 0 : i32
    %c0_i32_0 = arith.constant 0 : i32
    return %arg1, %arg0, %c0_i32 : i32, i32, i32
  }
}

</mosaic_0001>

<bundles_post_ra>
// kernel: tpu_custom_call.1
= control target key start
LH: loop header
LB: loop body
LE: loop exit
PB: predicated region body
PF: predicated region fallthrough
CT: control target
= control target key end

     0   :  { %15 = vsyncpa [#allocation4], 0  ;;  %s1055_s0 = inlined_call_operand.hbm [shape: f32[1,8,128], index: 0, kind: input, shape index: {}]   ;;  %s1056_s1 = inlined_call_operand.hbm [shape: f32[8,128], index: 1, kind: input, shape index: {}]   ;;  %s1057_s2 = inlined_call_operand.hbm [shape: f32[128,128], index: 2, kind: input, shape index: {}]   ;;  %s1058_s3 = inlined_call_operand.vmem [shape: f32[1,128], index: 3, kind: input, shape index: {}]   ;;  %s1059_s4 = inlined_call_operand.hbm [shape: f32[256,512], index: 4, kind: input, shape index: {}]   ;;  %s1060_s5 = inlined_call_operand.vmem [shape: f32[1,512], index: 5, kind: input, shape index: {}]   ;;  %s1061_s6 = inlined_call_operand.hbm [shape: f32[128,128], index: 6, kind: input, shape index: {}]   ;;  %s1062_s7 = inlined_call_operand.vmem [shape: f32[1,128], index: 7, kind: input, shape index: {}]   ;;  %s1063_s8 = inlined_call_operand.hbm [shape: f32[1,8,128], index: 8, kind: output, shape index: {0}]   ;;  %s1064_s9 = inlined_call_operand.hbm [shape: f32[1,8,128], index: 9, kind: output, shape index: {1}]  }
   0x1   :  { %16 = vsyncpa [#allocation7], 0 }
   0x2   :  { %17 = vsyncpa [#allocation10], 0 }
   0x3   :  { %18 = vsyncpa [#allocation5], 0 }
   0x4   :  { %19 = vsyncpa [#allocation14], 0  ;;  %s921_s30 = smov [#allocation6]   ;;  %s922_s11 = smov [#allocation9]  }
   0x5   :  { %s36_s10 = sshll.u32 %s921_s30, 4  ;;  %s59_s12 = sshll.u32 %s922_s11, 4  ;;  %s37_s10 = int_to_ptr.vmem [resolvable:$true] %s36_s10  ;;  %s60_s12 = int_to_ptr.vmem [resolvable:$true] %s59_s12 }
   0x6   :  { %s779_s13 = scalar_lea.vmem %s37_s10, 128  ;;  %p784_p1 = scmp.lt.s32.totalorder %s37_s10, %s37_s10 }
   0x7   :  { %p780_p0 = scmp.ne.s32.totalorder %s37_s10, %s779_s13  ;;  %p785_p2 = scmp.lt.s32.totalorder %s779_s13, %s779_s13 }
   0x9   :  { %p786_p3 = por %p785_p2, %p784_p1 }
   0xb   :  { %p787_p4 = pnand %p786_p3, %p780_p0 }
   0xd   :  { %790 = shalt.err (!%p787_p4)
}
   0xe   :  { %39 = dma.hbm_to_vmem [thread:$0]  %s1056_s1, 128, %s37_s10, [#allocation7]  }
   0xf   :  { %s799_s16 = scalar_lea.vmem %s60_s12, 16384  ;;  %p804_p6 = scmp.lt.s32.totalorder %s60_s12, %s60_s12 }
  0x10   :  { %p800_p5 = scmp.ne.s32.totalorder %s60_s12, %s799_s16  ;;  %p805_p7 = scmp.lt.s32.totalorder %s799_s16, %s799_s16 }
  0x12   :  { %p806_p8 = por %p805_p7, %p804_p6 }
  0x14   :  { %p807_p9 = pnand %p806_p8, %p800_p5 }
  0x16   :  { %810 = shalt.err (!%p807_p9)
}
  0x17   :  { %s923_s17 = smov 512   ;;  %s924_s18 = smov 32  }
  0x18   :  { %65 = dma.hbm_to_vmem [thread:$0]  %s1059_s4, 16384, %s60_s12, [#allocation10], %s923_s17, %s923_s17, %s924_s18  }
  0x19   :  { %s925_s21 = smov [#allocation3]   ;;  %s926_s23 = smov [#allocation8]  }
  0x1a   :  { %s26_s22 = sshll.u32 %s925_s21, 4  ;;  %s45_s24 = sshll.u32 %s926_s23, 4  ;;  %s27_s22 = int_to_ptr.vmem [resolvable:$true] %s26_s22  ;;  %s46_s24 = int_to_ptr.vmem [resolvable:$true] %s45_s24 }
  0x1b   :  { %s819_s1 = scalar_lea.vmem %s27_s22, 128  ;;  %p824_p11 = scmp.lt.s32.totalorder %s27_s22, %s27_s22 }
  0x1c   :  { %p820_p10 = scmp.ne.s32.totalorder %s27_s22, %s819_s1  ;;  %p825_p12 = scmp.lt.s32.totalorder %s819_s1, %s819_s1 }
  0x1e   :  { %p826_p13 = por %p825_p12, %p824_p11 }
  0x20   :  { %p827_p0 = pnand %p826_p13, %p820_p10 }
  0x22   :  { %830 = shalt.err (!%p827_p0)
}
  0x23   :  { %29 = dma.hbm_to_vmem [thread:$0]  %s1055_s0, 128, %s27_s22, [#allocation4]  }
  0x24   :  { %s839_s27 = scalar_lea.vmem %s46_s24, 2048  ;;  %p844_p2 = scmp.lt.s32.totalorder %s46_s24, %s46_s24 }
  0x25   :  { %p840_p1 = scmp.ne.s32.totalorder %s46_s24, %s839_s27  ;;  %p845_p3 = scmp.lt.s32.totalorder %s839_s27, %s839_s27 }
  0x27   :  { %p846_p4 = por %p845_p3, %p844_p2 }
  0x29   :  { %p847_p5 = pnand %p846_p4, %p840_p1 }
  0x2b   :  { %850 = shalt.err (!%p847_p5)
}
  0x2c   :  { %s927_s4 = smov 128   ;;  %s928_s28 = smov 8  }
  0x2d   :  { %51 = dma.hbm_to_vmem [thread:$0]  %s1057_s2, 2048, %s46_s24, [#allocation7], %s927_s4, %s927_s4, %s928_s28  }
  0x2e   :  { %s929_s10 = smov [#allocation11]  }
  0x2f   :  { %s73_s11 = sshll.u32 %s929_s10, 4  ;;  %s74_s11 = int_to_ptr.vmem [resolvable:$true] %s73_s11 }
  0x30   :  { %s859_s12 = scalar_lea.vmem %s74_s11, 2048  ;;  %p864_p7 = scmp.lt.s32.totalorder %s74_s11, %s74_s11 }
  0x31   :  { %p860_p6 = scmp.ne.s32.totalorder %s74_s11, %s859_s12  ;;  %p865_p8 = scmp.lt.s32.totalorder %s859_s12, %s859_s12 }
  0x33   :  { %p866_p9 = por %p865_p8, %p864_p7 }
  0x35   :  { %p867_p10 = pnand %p866_p9, %p860_p6 }
  0x37   :  { %870 = shalt.err (!%p867_p10)
}
  0x38   :  { %79 = dma.hbm_to_vmem [thread:$0]  %s1061_s6, 2048, %s74_s11, [#allocation10], %s927_s4, %s927_s4, %s928_s28  }
  0x39   :  { %911 = dma.done.wait [#allocation4], 128  }
  0x3a   :  { %912 = vsyncadd [#allocation4], 4294967168 }
  0x3b   :  { %913 = dma.done.wait [#allocation7], 2176  }
  0x3c   :  { %914 = vsyncadd [#allocation7], 4294965120 }
  0x3d   :  { %915 = dma.done.wait [#allocation10], 18432  }
  0x3e   :  { %916 = vsyncadd [#allocation10], 4294948864  ;;  %v930_v0 = vmov 0.0   ;;  %vm931_vm0 = vmmov 0   ;;  %v120_v1 = vld [vmem:[#allocation8 + $0x78] sm:$0xff]  ;;  %v119_v2 = vld [vmem:[#allocation8 + $0x70] sm:$0xff] }
  0x3f   :  { %678 = vmatprep.subr.mxu0 %v930_v0  ;;  %710 = vmatprep.mubr.msk.f32.mxu0 %vm931_vm0, %v930_v0  ;;  %v118_v3 = vld [vmem:[#allocation8 + $0x68] sm:$0xff]  ;;  %v117_v4 = vld [vmem:[#allocation8 + $0x60] sm:$0xff]  ;;  %v116_v6 = vld [vmem:[#allocation8 + $0x58] sm:$0xff] }
  0x40   :  { %679 = vmatpush3.msra.mxu0 %v120_v1  ;;  %v263_v5 = vld [vmem:[#allocation9 + $0x1e8] sm:$0xff]  ;;  %v262_v7 = vld [vmem:[#allocation9 + $0x1e0] sm:$0xff]  ;;  %v115_v10 = vld [vmem:[#allocation8 + $0x50] sm:$0xff] }
  0x41   :  { %680 = vmatprep.subr.mxu0 %v930_v0  ;;  %352 = vmatprep.subr.mxu1 %v263_v5  ;;  %v259_v8 = vld [vmem:[#allocation9 + $0x1c8] sm:$0xff]  ;;  %v258_v9 = vld [vmem:[#allocation9 + $0x1c0] sm:$0xff]  ;;  %v112_v20 = vld [vmem:[#allocation8 + $0x38] sm:$0xff] }
  0x42   :  { %681 = vmatpush3.msra.mxu0 %v119_v2  ;;  %353 = vmatpush1.msra.mxu1 %v262_v7  ;;  %v255_v11 = vld [vmem:[#allocation9 + $0x1a8] sm:$0xff]  ;;  %v254_v12 = vld [vmem:[#allocation9 + $0x1a0] sm:$0xff]  ;;  %v111_v23 = vld [vmem:[#allocation8 + $0x30] sm:$0xff] }
  0x43   :  { %682 = vmatprep.subr.mxu0 %v930_v0  ;;  %354 = vmatprep.subr.mxu1 %v259_v8  ;;  %v251_v13 = vld [vmem:[#allocation9 + $0x188] sm:$0xff]  ;;  %v250_v15 = vld [vmem:[#allocation9 + $0x180] sm:$0xff]  ;;  %v108_v32 = vld [vmem:[#allocation8 + $0x18] sm:$0xff] }
  0x44   :  { %683 = vmatpush3.msra.mxu0 %v118_v3  ;;  %355 = vmatpush1.msra.mxu1 %v258_v9  ;;  %v114_v14 = vld [vmem:[#allocation8 + $0x48] sm:$0xff]  ;;  %v113_v17 = vld [vmem:[#allocation8 + $0x40] sm:$0xff]  ;;  %v107_v35 = vld [vmem:[#allocation8 + $0x10] sm:$0xff] }
  0x45   :  { %684 = vmatprep.subr.mxu0 %v930_v0  ;;  %356 = vmatprep.subr.mxu1 %v255_v11  ;;  %v247_v16 = vld [vmem:[#allocation9 + $0x168] sm:$0xff]  ;;  %v246_v18 = vld [vmem:[#allocation9 + $0x160] sm:$0xff]  ;;  %v103_v43 = vld [vmem:[#allocation3] sm:$0xff] }
  0x46   :  { %685 = vmatpush3.msra.mxu0 %v117_v4  ;;  %357 = vmatpush1.msra.mxu1 %v254_v12  ;;  %v243_v19 = vld [vmem:[#allocation9 + $0x148] sm:$0xff]  ;;  %v242_v21 = vld [vmem:[#allocation9 + $0x140] sm:$0xff]  ;;  %v265_v44 = vld [vmem:[#allocation9 + $0x1f8] sm:$0xff] }
  0x47   :  { %686 = vmatprep.subr.mxu0 %v930_v0  ;;  %358 = vmatprep.subr.mxu1 %v251_v13  ;;  %v239_v22 = vld [vmem:[#allocation9 + $0x128] sm:$0xff]  ;;  %v238_v24 = vld [vmem:[#allocation9 + $0x120] sm:$0xff]  ;;  %v264_v45 = vld [vmem:[#allocation9 + $0x1f0] sm:$0xff] }
  0x48   :  { %687 = vmatpush3.msra.mxu0 %v116_v6  ;;  %359 = vmatpush1.msra.mxu1 %v250_v15  ;;  %v235_v25 = vld [vmem:[#allocation9 + $0x108] sm:$0xff]  ;;  %v234_v27 = vld [vmem:[#allocation9 + $0x100] sm:$0xff]  ;;  %v261_v47 = vld [vmem:[#allocation9 + $0x1d8] sm:$0xff] }
  0x49   :  { %688 = vmatprep.subr.mxu0 %v930_v0  ;;  %360 = vmatprep.subr.mxu1 %v247_v16  ;;  %v110_v26 = vld [vmem:[#allocation8 + $0x28] sm:$0xff]  ;;  %v109_v29 = vld [vmem:[#allocation8 + $0x20] sm:$0xff]  ;;  %v260_v49 = vld [vmem:[#allocation9 + $0x1d0] sm:$0xff] }
  0x4a   :  { %689 = vmatpush3.msra.mxu0 %v115_v10  ;;  %361 = vmatpush1.msra.mxu1 %v246_v18  ;;  %v231_v28 = vld [vmem:[#allocation9 + $0xe8] sm:$0xff]  ;;  %v230_v30 = vld [vmem:[#allocation9 + $0xe0] sm:$0xff]  ;;  %v257_v51 = vld [vmem:[#allocation9 + $0x1b8] sm:$0xff] }
  0x4b   :  { %690 = vmatprep.subr.mxu0 %v930_v0  ;;  %362 = vmatprep.subr.mxu1 %v243_v19  ;;  %v227_v31 = vld [vmem:[#allocation9 + $0xc8] sm:$0xff]  ;;  %v226_v33 = vld [vmem:[#allocation9 + $0xc0] sm:$0xff]  ;;  %v256_v53 = vld [vmem:[#allocation9 + $0x1b0] sm:$0xff] }
  0x4c   :  { %691 = vmatpush3.msra.mxu0 %v114_v14  ;;  %363 = vmatpush1.msra.mxu1 %v242_v21  ;;  %v223_v34 = vld [vmem:[#allocation9 + $0xa8] sm:$0xff]  ;;  %v222_v36 = vld [vmem:[#allocation9 + $0xa0] sm:$0xff]  ;;  %v253_v55 = vld [vmem:[#allocation9 + $0x198] sm:$0xff] }
  0x4d   :  { %692 = vmatprep.subr.mxu0 %v930_v0  ;;  %364 = vmatprep.subr.mxu1 %v239_v22  ;;  %v219_v37 = vld [vmem:[#allocation9 + $0x88] sm:$0xff]  ;;  %v218_v39 = vld [vmem:[#allocation9 + $0x80] sm:$0xff]  ;;  %v252_v57 = vld [vmem:[#allocation9 + $0x190] sm:$0xff] }
  0x4e   :  { %693 = vmatpush3.msra.mxu0 %v113_v17  ;;  %365 = vmatpush1.msra.mxu1 %v238_v24  ;;  %v106_v38 = vld [vmem:[#allocation8 + $0x8] sm:$0xff]  ;;  %v105_v41 = vld [vmem:[#allocation8] sm:$0xff]  ;;  %v249_v59 = vld [vmem:[#allocation9 + $0x178] sm:$0xff] }
  0x4f   :  { %694 = vmatprep.subr.mxu0 %v930_v0  ;;  %366 = vmatprep.subr.mxu1 %v235_v25  ;;  %v215_v40 = vld [vmem:[#allocation9 + $0x68] sm:$0xff]  ;;  %v214_v42 = vld [vmem:[#allocation9 + $0x60] sm:$0xff]  ;;  %v248_v61 = vld [vmem:[#allocation9 + $0x170] sm:$0xff] }
  0x50   :  { %695 = vmatpush3.msra.mxu0 %v112_v20  ;;  %367 = vmatpush1.msra.mxu1 %v234_v27  ;;  %v211_v46 = vld [vmem:[#allocation9 + $0x48] sm:$0xff]  ;;  %v210_v48 = vld [vmem:[#allocation9 + $0x40] sm:$0xff]  ;;  %v245_v63 = vld [vmem:[#allocation9 + $0x158] sm:$0xff] }
  0x51   :  { %696 = vmatprep.subr.mxu0 %v930_v0  ;;  %368 = vmatprep.subr.mxu1 %v231_v28  ;;  %v207_v50 = vld [vmem:[#allocation9 + $0x28] sm:$0xff]  ;;  %v206_v52 = vld [vmem:[#allocation9 + $0x20] sm:$0xff]  ;;  %v244_v2 = vld [vmem:[#allocation9 + $0x150] sm:$0xff] }
  0x52   :  { %697 = vmatpush3.msra.mxu0 %v111_v23  ;;  %369 = vmatpush1.msra.mxu1 %v230_v30  ;;  %v203_v54 = vld [vmem:[#allocation9 + $0x8] sm:$0xff]  ;;  %v202_v56 = vld [vmem:[#allocation9] sm:$0xff]  ;;  %v241_v4 = vld [vmem:[#allocation9 + $0x138] sm:$0xff] }
  0x53   :  { %698 = vmatprep.subr.mxu0 %v930_v0  ;;  %370 = vmatprep.subr.mxu1 %v227_v31  ;;  %v327_v58 = vld [vmem:[#allocation9 + $0x3e8] sm:$0xff]  ;;  %v326_v60 = vld [vmem:[#allocation9 + $0x3e0] sm:$0xff]  ;;  %v240_v6 = vld [vmem:[#allocation9 + $0x130] sm:$0xff] }
  0x54   :  { %699 = vmatpush3.msra.mxu0 %v110_v26  ;;  %371 = vmatpush1.msra.mxu1 %v226_v33  ;;  %v323_v62 = vld [vmem:[#allocation9 + $0x3c8] sm:$0xff]  ;;  %v322_v1 = vld [vmem:[#allocation9 + $0x3c0] sm:$0xff]  ;;  %v237_v8 = vld [vmem:[#allocation9 + $0x118] sm:$0xff] }
  0x55   :  { %700 = vmatprep.subr.mxu0 %v930_v0  ;;  %372 = vmatprep.subr.mxu1 %v223_v34  ;;  %v319_v3 = vld [vmem:[#allocation9 + $0x3a8] sm:$0xff]  ;;  %v318_v5 = vld [vmem:[#allocation9 + $0x3a0] sm:$0xff]  ;;  %v236_v10 = vld [vmem:[#allocation9 + $0x110] sm:$0xff] }
  0x56   :  { %701 = vmatpush3.msra.mxu0 %v109_v29  ;;  %373 = vmatpush1.msra.mxu1 %v222_v36  ;;  %v315_v7 = vld [vmem:[#allocation9 + $0x388] sm:$0xff]  ;;  %v314_v9 = vld [vmem:[#allocation9 + $0x380] sm:$0xff]  ;;  %v233_v12 = vld [vmem:[#allocation9 + $0xf8] sm:$0xff] }
  0x57   :  { %702 = vmatprep.subr.mxu0 %v930_v0  ;;  %374 = vmatprep.subr.mxu1 %v219_v37  ;;  %v311_v11 = vld [vmem:[#allocation9 + $0x368] sm:$0xff]  ;;  %v310_v13 = vld [vmem:[#allocation9 + $0x360] sm:$0xff]  ;;  %v232_v14 = vld [vmem:[#allocation9 + $0xf0] sm:$0xff] }
  0x58   :  { %703 = vmatpush3.msra.mxu0 %v108_v32  ;;  %375 = vmatpush1.msra.mxu1 %v218_v39  ;;  %v307_v15 = vld [vmem:[#allocation9 + $0x348] sm:$0xff]  ;;  %v229_v16 = vld [vmem:[#allocation9 + $0xd8] sm:$0xff]  ;;  %v306_v17 = vld [vmem:[#allocation9 + $0x340] sm:$0xff] }
  0x59   :  { %704 = vmatprep.subr.mxu0 %v930_v0  ;;  %376 = vmatprep.subr.mxu1 %v215_v40  ;;  %v228_v18 = vld [vmem:[#allocation9 + $0xd0] sm:$0xff]  ;;  %v303_v19 = vld [vmem:[#allocation9 + $0x328] sm:$0xff]  ;;  %v225_v20 = vld [vmem:[#allocation9 + $0xb8] sm:$0xff] }
  0x5a   :  { %705 = vmatpush3.msra.mxu0 %v107_v35  ;;  %377 = vmatpush1.msra.mxu1 %v214_v42  ;;  %v302_v21 = vld [vmem:[#allocation9 + $0x320] sm:$0xff]  ;;  %v224_v22 = vld [vmem:[#allocation9 + $0xb0] sm:$0xff]  ;;  %v299_v23 = vld [vmem:[#allocation9 + $0x308] sm:$0xff] }
  0x5b   :  { %706 = vmatprep.subr.mxu0 %v930_v0  ;;  %378 = vmatprep.subr.mxu1 %v211_v46  ;;  %v221_v24 = vld [vmem:[#allocation9 + $0x98] sm:$0xff]  ;;  %v298_v25 = vld [vmem:[#allocation9 + $0x300] sm:$0xff]  ;;  %v220_v26 = vld [vmem:[#allocation9 + $0x90] sm:$0xff] }
  0x5c   :  { %707 = vmatpush3.msra.mxu0 %v106_v38  ;;  %379 = vmatpush1.msra.mxu1 %v210_v48  ;;  %v295_v27 = vld [vmem:[#allocation9 + $0x2e8] sm:$0xff]  ;;  %v217_v28 = vld [vmem:[#allocation9 + $0x78] sm:$0xff]  ;;  %v294_v29 = vld [vmem:[#allocation9 + $0x2e0] sm:$0xff] }
  0x5d   :  { %708 = vmatprep.subr.mxu0 %v930_v0  ;;  %380 = vmatprep.subr.mxu1 %v207_v50  ;;  %v216_v30 = vld [vmem:[#allocation9 + $0x70] sm:$0xff]  ;;  %v291_v31 = vld [vmem:[#allocation9 + $0x2c8] sm:$0xff]  ;;  %v213_v32 = vld [vmem:[#allocation9 + $0x58] sm:$0xff] }
  0x5e   :  { %709 = vmatpush3.msra.mxu0 %v105_v41  ;;  %381 = vmatpush1.msra.mxu1 %v206_v52  ;;  %v290_v33 = vld [vmem:[#allocation9 + $0x2c0] sm:$0xff]  ;;  %v212_v34 = vld [vmem:[#allocation9 + $0x50] sm:$0xff]  ;;  %v287_v35 = vld [vmem:[#allocation9 + $0x2a8] sm:$0xff] }
  0x5f   :  { %711 = vmatmul.mubr.f32.vlgmr.msra.gmra.mxu0 %v103_v43  ;;  %423 = vmatprep.subr.mxu0 %v265_v44  ;;  %v209_v36 = vld [vmem:[#allocation9 + $0x38] sm:$0xff]  ;;  %v286_v37 = vld [vmem:[#allocation9 + $0x2a0] sm:$0xff]  ;;  %v208_v38 = vld [vmem:[#allocation9 + $0x30] sm:$0xff] }
  0x60   :  { %424 = vmatpush1.msra.mxu0 %v264_v45  ;;  %382 = vmatprep.subr.mxu1 %v203_v54  ;;  %v283_v39 = vld [vmem:[#allocation9 + $0x288] sm:$0xff]  ;;  %v205_v40 = vld [vmem:[#allocation9 + $0x18] sm:$0xff]  ;;  %v282_v41 = vld [vmem:[#allocation9 + $0x280] sm:$0xff] }
  0x61   :  { %425 = vmatprep.subr.mxu0 %v261_v47  ;;  %383 = vmatpush1.msra.mxu1 %v202_v56  ;;  %v204_v42 = vld [vmem:[#allocation9 + $0x10] sm:$0xff]  ;;  %v279_v43 = vld [vmem:[#allocation9 + $0x268] sm:$0xff]  ;;  %v329_v44 = vld [vmem:[#allocation9 + $0x3f8] sm:$0xff] }
  0x62   :  { %426 = vmatpush1.msra.mxu0 %v260_v49  ;;  %384 = vmatprep.subr.mxu1 %v327_v58  ;;  %v278_v45 = vld [vmem:[#allocation9 + $0x260] sm:$0xff]  ;;  %v328_v46 = vld [vmem:[#allocation9 + $0x3f0] sm:$0xff]  ;;  %v275_v47 = vld [vmem:[#allocation9 + $0x248] sm:$0xff] }
  0x63   :  { %427 = vmatprep.subr.mxu0 %v257_v51  ;;  %385 = vmatpush2.msra.mxu1 %v326_v60  ;;  %v325_v48 = vld [vmem:[#allocation9 + $0x3d8] sm:$0xff]  ;;  %v324_v49 = vld [vmem:[#allocation9 + $0x3d0] sm:$0xff] }
  0x64   :  { %428 = vmatpush1.msra.mxu0 %v256_v53  ;;  %386 = vmatprep.subr.mxu1 %v323_v62  ;;  %v321_v50 = vld [vmem:[#allocation9 + $0x3b8] sm:$0xff]  ;;  %v320_v51 = vld [vmem:[#allocation9 + $0x3b0] sm:$0xff] }
  0x65   :  { %429 = vmatprep.subr.mxu0 %v253_v55  ;;  %387 = vmatpush2.msra.mxu1 %v322_v1  ;;  %v317_v52 = vld [vmem:[#allocation9 + $0x398] sm:$0xff]  ;;  %v316_v53 = vld [vmem:[#allocation9 + $0x390] sm:$0xff] }
  0x66   :  { %430 = vmatpush1.msra.mxu0 %v252_v57  ;;  %388 = vmatprep.subr.mxu1 %v319_v3  ;;  %v313_v54 = vld [vmem:[#allocation9 + $0x378] sm:$0xff]  ;;  %v312_v55 = vld [vmem:[#allocation9 + $0x370] sm:$0xff] }
  0x67   :  { %431 = vmatprep.subr.mxu0 %v249_v59  ;;  %389 = vmatpush2.msra.mxu1 %v318_v5  ;;  %v309_v56 = vld [vmem:[#allocation9 + $0x358] sm:$0xff]  ;;  %v308_v57 = vld [vmem:[#allocation9 + $0x350] sm:$0xff] }
  0x68   :  { %432 = vmatpush1.msra.mxu0 %v248_v61  ;;  %390 = vmatprep.subr.mxu1 %v315_v7  ;;  %v305_v58 = vld [vmem:[#allocation9 + $0x338] sm:$0xff]  ;;  %v304_v59 = vld [vmem:[#allocation9 + $0x330] sm:$0xff] }
  0x69   :  { %433 = vmatprep.subr.mxu0 %v245_v63  ;;  %391 = vmatpush2.msra.mxu1 %v314_v9  ;;  %v301_v60 = vld [vmem:[#allocation9 + $0x318] sm:$0xff]  ;;  %v300_v61 = vld [vmem:[#allocation9 + $0x310] sm:$0xff] }
  0x6a   :  { %434 = vmatpush1.msra.mxu0 %v244_v2  ;;  %392 = vmatprep.subr.mxu1 %v311_v11  ;;  %v297_v62 = vld [vmem:[#allocation9 + $0x2f8] sm:$0xff]  ;;  %v296_v63 = vld [vmem:[#allocation9 + $0x2f0] sm:$0xff] }
  0x6b   :  { %435 = vmatprep.subr.mxu0 %v241_v4  ;;  %393 = vmatpush2.msra.mxu1 %v310_v13  ;;  %v293_v1 = vld [vmem:[#allocation9 + $0x2d8] sm:$0xff]  ;;  %v292_v2 = vld [vmem:[#allocation9 + $0x2d0] sm:$0xff] }
  0x6c   :  { %436 = vmatpush1.msra.mxu0 %v240_v6  ;;  %394 = vmatprep.subr.mxu1 %v307_v15  ;;  %v289_v3 = vld [vmem:[#allocation9 + $0x2b8] sm:$0xff]  ;;  %v288_v4 = vld [vmem:[#allocation9 + $0x2b0] sm:$0xff] }
  0x6d   :  { %437 = vmatprep.subr.mxu0 %v237_v8  ;;  %395 = vmatpush2.msra.mxu1 %v306_v17  ;;  %v285_v5 = vld [vmem:[#allocation9 + $0x298] sm:$0xff]  ;;  %v284_v6 = vld [vmem:[#allocation9 + $0x290] sm:$0xff] }
  0x6e   :  { %438 = vmatpush1.msra.mxu0 %v236_v10  ;;  %396 = vmatprep.subr.mxu1 %v303_v19  ;;  %v281_v7 = vld [vmem:[#allocation9 + $0x278] sm:$0xff]  ;;  %v280_v8 = vld [vmem:[#allocation9 + $0x270] sm:$0xff]  ;;  %v274_v10 = vld [vmem:[#allocation9 + $0x240] sm:$0xff] }
  0x6f   :  { %439 = vmatprep.subr.mxu0 %v233_v12  ;;  %397 = vmatpush2.msra.mxu1 %v302_v21  ;;  %v277_v9 = vld [vmem:[#allocation9 + $0x258] sm:$0xff]  ;;  %v276_v11 = vld [vmem:[#allocation9 + $0x250] sm:$0xff]  ;;  %v271_v12 = vld [vmem:[#allocation9 + $0x228] sm:$0xff] }
  0x70   :  { %440 = vmatpush1.msra.mxu0 %v232_v14  ;;  %398 = vmatprep.subr.mxu1 %v299_v23  ;;  %v273_v13 = vld [vmem:[#allocation9 + $0x238] sm:$0xff]  ;;  %v270_v14 = vld [vmem:[#allocation9 + $0x220] sm:$0xff]  ;;  %v272_v15 = vld [vmem:[#allocation9 + $0x230] sm:$0xff] }
  0x71   :  { %441 = vmatprep.subr.mxu0 %v229_v16  ;;  %399 = vmatpush2.msra.mxu1 %v298_v25  ;;  %v267_v16 = vld [vmem:[#allocation9 + $0x208] sm:$0xff]  ;;  %v269_v17 = vld [vmem:[#allocation9 + $0x218] sm:$0xff]  ;;  %v640_v21 = vld [vmem:[%s1058_s3] ss:$0 sm:$0xff] }
  0x72   :  { %442 = vmatpush1.msra.mxu0 %v228_v18  ;;  %400 = vmatprep.subr.mxu1 %v295_v27  ;;  %v266_v18 = vld [vmem:[#allocation9 + $0x200] sm:$0xff]  ;;  %v1017_v19 = vld [vmem:[#allocation6] sm:$0xff]  ;;  %v527_v27 = vld [vmem:[#allocation11 + $0x70] sm:$0xff] }
  0x73   :  { %443 = vmatprep.subr.mxu0 %v225_v20  ;;  %401 = vmatpush2.msra.mxu1 %v294_v29  ;;  %v268_v20 = vld [vmem:[#allocation9 + $0x210] sm:$0xff]  ;;  %v525_v29 = vld [vmem:[#allocation11 + $0x60] sm:$0xff] }
  0x74   :  { %444 = vmatpush1.msra.mxu0 %v224_v22  ;;  %402 = vmatprep.subr.mxu1 %v291_v31  ;;  %v523_v31 = vld [vmem:[#allocation11 + $0x50] sm:$0xff] }
  0x75   :  { %445 = vmatprep.subr.mxu0 %v221_v24  ;;  %403 = vmatpush2.msra.mxu1 %v290_v33  ;;  %v521_v33 = vld [vmem:[#allocation11 + $0x40] sm:$0xff] }
  0x76   :  { %446 = vmatpush1.msra.mxu0 %v220_v26  ;;  %404 = vmatprep.subr.mxu1 %v287_v35  ;;  %v528_v26 = vld [vmem:[#allocation11 + $0x78] sm:$0xff]  ;;  %v519_v35 = vld [vmem:[#allocation11 + $0x30] sm:$0xff] }
  0x77   :  { %447 = vmatprep.subr.mxu0 %v217_v28  ;;  %405 = vmatpush2.msra.mxu1 %v286_v37  ;;  %v526_v28 = vld [vmem:[#allocation11 + $0x68] sm:$0xff]  ;;  %v517_v37 = vld [vmem:[#allocation11 + $0x20] sm:$0xff] }
  0x78   :  { %448 = vmatpush1.msra.mxu0 %v216_v30  ;;  %406 = vmatprep.subr.mxu1 %v283_v39  ;;  %v524_v30 = vld [vmem:[#allocation11 + $0x58] sm:$0xff]  ;;  %v515_v39 = vld [vmem:[#allocation11 + $0x10] sm:$0xff] }
  0x79   :  { %449 = vmatprep.subr.mxu0 %v213_v32  ;;  %407 = vmatpush2.msra.mxu1 %v282_v41  ;;  %v522_v32 = vld [vmem:[#allocation11 + $0x48] sm:$0xff]  ;;  %v513_v41 = vld [vmem:[#allocation11] sm:$0xff] }
  0x7a   :  { %450 = vmatpush1.msra.mxu0 %v212_v34  ;;  %408 = vmatprep.subr.mxu1 %v279_v43  ;;  %v520_v34 = vld [vmem:[#allocation11 + $0x38] sm:$0xff] }
  0x7b   :  { %451 = vmatprep.subr.mxu0 %v209_v36  ;;  %409 = vmatpush2.msra.mxu1 %v278_v45  ;;  %v518_v36 = vld [vmem:[#allocation11 + $0x28] sm:$0xff]  ;;  %v330_v45 = vld [vmem:[%s1060_s5] sm:$0xf]  ;;  %s932_s5 = smov [#allocation13]  }
  0x7c   :  { %452 = vmatpush1.msra.mxu0 %v208_v38  ;;  %410 = vmatprep.subr.mxu1 %v275_v47  ;;  %v516_v38 = vld [vmem:[#allocation11 + $0x18] sm:$0xff]  ;;  %s625_s15 = sshll.u32 %s932_s5, 4  ;;  %s626_s15 = int_to_ptr.vmem [resolvable:$true] %s625_s15 }
  0x7d   :  { %453 = vmatprep.subr.mxu0 %v205_v40  ;;  %411 = vmatpush2.msra.mxu1 %v274_v10  ;;  %v514_v40 = vld [vmem:[#allocation11 + $0x8] sm:$0xff]  ;;  %s871_s16 = scalar_lea.vmem %s626_s15, 128  ;;  %p876_p12 = scmp.lt.s32.totalorder %s626_s15, %s626_s15 }
  0x7e   :  { %454 = vmatpush1.msra.mxu0 %v204_v42  ;;  %412 = vmatprep.subr.mxu1 %v271_v12  ;;  %v332_v42 = vlaneseq  ;;  %p872_p11 = scmp.ne.s32.totalorder %s626_s15, %s871_s16  ;;  %p877_p13 = scmp.lt.s32.totalorder %s871_s16, %s871_s16 }
  0x7f   :  { %455 = vmatprep.subr.mxu0 %v329_v44  ;;  %413 = vmatpush2.msra.mxu1 %v270_v14 }
  0x80   :  { %456 = vmatpush2.msra.mxu0 %v328_v46  ;;  %414 = vmatprep.subr.mxu1 %v267_v16  ;;  %v333_v43 = vshrl.u32 %v332_v42, 7  ;;  %p878_p0 = por %p877_p13, %p876_p12 }
  0x81   :  { %457 = vmatprep.subr.mxu0 %v325_v48  ;;  %415 = vmatpush2.msra.mxu1 %v266_v18 }
  0x82   :  { %458 = vmatpush2.msra.mxu0 %v324_v49  ;;  %416 = vmatprep.mubr.f32.mxu1 %v1017_v19  ;;  %v334_v44 = vsub.s32 0, %v333_v43  ;;  %v338_v47 = vsub.s32 1, %v333_v43  ;;  %p879_p1 = pnand %p878_p0, %p872_p11 }
  0x83   :  { %459 = vmatprep.subr.mxu0 %v321_v50  ;;  %487 = vmatprep.mubr.f32.mxu0 %v1017_v19 }
  0x84   :  { %460 = vmatpush2.msra.mxu0 %v320_v51  ;;  %713 = vmatprep.subr.mxu1 %v930_v0  ;;  %v335_v46 = vrot.slane %v330_v45, %v334_v44  ;;  %v339_v51 = vrot.slane %v330_v45, %v338_v47 }
  0x85   :  { %461 = vmatprep.subr.mxu0 %v317_v52 }
  0x86   :  { %462 = vmatpush2.msra.mxu0 %v316_v53 }
  0x87   :  { %463 = vmatprep.subr.mxu0 %v313_v54 }
  0x88   :  { %464 = vmatpush2.msra.mxu0 %v312_v55 }
  0x89   :  { %465 = vmatprep.subr.mxu0 %v309_v56  ;;  %v346_v56 = vsub.s32 3, %v333_v43 }
  0x8a   :  { %466 = vmatpush2.msra.mxu0 %v308_v57 }
  0x8b   :  { %467 = vmatprep.subr.mxu0 %v305_v58  ;;  %v342_v58 = vsub.s32 2, %v333_v43 }
  0x8c   :  { %468 = vmatpush2.msra.mxu0 %v304_v59 }
  0x8d   :  { %469 = vmatprep.subr.mxu0 %v301_v60  ;;  %v347_v60 = vrot.slane %v330_v45, %v346_v56 }
  0x8e   :  { %470 = vmatpush2.msra.mxu0 %v300_v61 }
  0x8f   :  { %471 = vmatprep.subr.mxu0 %v297_v62  ;;  %v343_v62 = vrot.slane %v330_v45, %v342_v58 }
  0x90   :  { %472 = vmatpush2.msra.mxu0 %v296_v63 }
  0x91   :  { %473 = vmatprep.subr.mxu0 %v293_v1 }
  0x92   :  { %474 = vmatpush2.msra.mxu0 %v292_v2 }
  0x93   :  { %475 = vmatprep.subr.mxu0 %v289_v3 }
  0x94   :  { %476 = vmatpush2.msra.mxu0 %v288_v4 }
  0x95   :  { %477 = vmatprep.subr.mxu0 %v285_v5 }
  0x96   :  { %478 = vmatpush2.msra.mxu0 %v284_v6 }
  0x97   :  { %479 = vmatprep.subr.mxu0 %v281_v7 }
  0x98   :  { %480 = vmatpush2.msra.mxu0 %v280_v8 }
  0x99   :  { %481 = vmatprep.subr.mxu0 %v277_v9 }
  0x9a   :  { %482 = vmatpush2.msra.mxu0 %v276_v11 }
  0x9b   :  { %483 = vmatprep.subr.mxu0 %v273_v13 }
  0x9c   :  { %484 = vmatpush2.msra.mxu0 %v272_v15 }
  0x9d   :  { %485 = vmatprep.subr.mxu0 %v269_v17 }
  0x9e   :  { %486 = vmatpush2.msra.mxu0 %v268_v20 }
 0x11f   :  { %v194_v22 = vpop.f32.mrf.mxu0 }
 0x120   :  { %v195_v23 = vadd.f32 %v640_v21, %v194_v22 }
 0x121   :  { %v712_v24 = vpop.f32.mrf.mxu0 }
 0x122   :  { %v198_v25 = vmax.f32 %v195_v23, 0.0 }
 0x124   :  { %417 = vmatmul.mubr.f32.vlgmr.msra.gmra.mxu1 %v198_v25  ;;  %488 = vmatmul.mubr.f32.vlgmr.msra.gmra.mxu0 %v198_v25 }
 0x125   :  { %745 = vmatprep.mubr.msk.f32.mxu1 %vm931_vm0, %v930_v0  ;;  %714 = vmatpush3.msra.mxu1 %v528_v26 }
 0x126   :  { %715 = vmatprep.subr.mxu1 %v930_v0 }
 0x127   :  { %716 = vmatpush3.msra.mxu1 %v527_v27 }
 0x128   :  { %717 = vmatprep.subr.mxu1 %v930_v0 }
 0x129   :  { %718 = vmatpush3.msra.mxu1 %v526_v28 }
 0x12a   :  { %719 = vmatprep.subr.mxu1 %v930_v0 }
 0x12b   :  { %720 = vmatpush3.msra.mxu1 %v525_v29 }
 0x12c   :  { %721 = vmatprep.subr.mxu1 %v930_v0 }
 0x12d   :  { %722 = vmatpush3.msra.mxu1 %v524_v30 }
 0x12e   :  { %723 = vmatprep.subr.mxu1 %v930_v0 }
 0x12f   :  { %724 = vmatpush3.msra.mxu1 %v523_v31 }
 0x130   :  { %725 = vmatprep.subr.mxu1 %v930_v0 }
 0x131   :  { %726 = vmatpush3.msra.mxu1 %v522_v32 }
 0x132   :  { %727 = vmatprep.subr.mxu1 %v930_v0 }
 0x133   :  { %728 = vmatpush3.msra.mxu1 %v521_v33 }
 0x134   :  { %729 = vmatprep.subr.mxu1 %v930_v0 }
 0x135   :  { %730 = vmatpush3.msra.mxu1 %v520_v34 }
 0x136   :  { %731 = vmatprep.subr.mxu1 %v930_v0 }
 0x137   :  { %732 = vmatpush3.msra.mxu1 %v519_v35 }
 0x138   :  { %733 = vmatprep.subr.mxu1 %v930_v0 }
 0x139   :  { %734 = vmatpush3.msra.mxu1 %v518_v36 }
 0x13a   :  { %735 = vmatprep.subr.mxu1 %v930_v0 }
 0x13b   :  { %736 = vmatpush3.msra.mxu1 %v517_v37 }
 0x13c   :  { %737 = vmatprep.subr.mxu1 %v930_v0 }
 0x13d   :  { %738 = vmatpush3.msra.mxu1 %v516_v38 }
 0x13e   :  { %739 = vmatprep.subr.mxu1 %v930_v0 }
 0x13f   :  { %740 = vmatpush3.msra.mxu1 %v515_v39 }
 0x140   :  { %741 = vmatprep.subr.mxu1 %v930_v0 }
 0x141   :  { %742 = vmatpush3.msra.mxu1 %v514_v40 }
 0x142   :  { %743 = vmatprep.subr.mxu1 %v930_v0 }
 0x143   :  { %744 = vmatpush3.msra.mxu1 %v513_v41 }
 0x1e4   :  { %v418_v48 = vpop.f32.mrf.mxu1  ;;  %v489_v57 = vpop.f32.mrf.mxu0 }
 0x1e5   :  { %v419_v49 = vadd.f32 %v418_v48, %v335_v46  ;;  %v490_v3 = vadd.f32 %v489_v57, %v343_v62 }
 0x1e6   :  { %v420_v52 = vpop.f32.mrf.mxu1  ;;  %v491_v61 = vpop.f32.mrf.mxu0 }
 0x1e7   :  { %v641_v50 = vmul.f32 -1.442695, %v419_v49  ;;  %v421_v53 = vadd.f32 %v420_v52, %v339_v51  ;;  %v492_v1 = vadd.f32 %v491_v61, %v347_v60 }
 0x1e9   :  { %761 = vpow2.f32 %v641_v50  ;;  %v642_v54 = vmul.f32 -1.442695, %v421_v53 }
 0x1eb   :  { %763 = vpow2.f32 %v642_v54 }
 0x1f6   :  { %v762_v0 = vpop.eup %761 }
 0x1f7   :  { %v497_v55 = vadd.f32 1.0, %v762_v0 }
 0x1f8   :  { %v764_v59 = vpop.eup %763 }
 0x1f9   :  { %765 = vrcp.f32 %v497_v55  ;;  %v503_v63 = vadd.f32 1.0, %v764_v59 }
 0x1fb   :  { %767 = vrcp.f32 %v503_v63 }
 0x206   :  { %v766_v2 = vpop.eup %765 }
 0x207   :  { %v506_v4 = vmul.f32 %v766_v2, %v492_v1 }
 0x208   :  { %v768_v6 = vpop.eup %767 }
 0x209   :  { %v507_v5 = vadd.f32 %v506_v4, %v490_v3  ;;  %v509_v7 = vsub.f32 1.0, %v768_v6  ;;  %v511_v10 = vmul.f32 %v768_v6, %v1017_v19 }
 0x20b   :  { %769 = vtanh.f32 %v507_v5 }
 0x218   :  { %v770_v8 = vpop.eup %769 }
 0x219   :  { %v510_v9 = vmul.f32 %v770_v8, %v509_v7 }
 0x21b   :  { %v512_v11 = vadd.f32 %v511_v10, %v510_v9 }
 0x21d   :  { %746 = vmatmul.mubr.f32.vlgmr.msra.gmra.mxu1 %v512_v11  ;;  %608 = vst [vmem:[#allocation13] sm:$0xff] %v512_v11 }
 0x21e   :  { %882 = shalt.err (!%p879_p1)
}
 0x21f   :  { %628 = dma.vmem_to_hbm [thread:$0]  %s626_s15, 128, %s1064_s9, [#allocation14]   ;;  %v643_v12 = vld [vmem:[%s1062_s7] ss:$0 sm:$0xff] }
 0x220   :  { %s933_s21 = smov [#allocation12]  }
 0x221   :  { %s615_s22 = sshll.u32 %s933_s21, 4  ;;  %s616_s22 = int_to_ptr.vmem [resolvable:$true] %s615_s22 }
 0x222   :  { %s891_s23 = scalar_lea.vmem %s616_s22, 128  ;;  %p896_p3 = scmp.lt.s32.totalorder %s616_s22, %s616_s22 }
 0x223   :  { %p892_p2 = scmp.ne.s32.totalorder %s616_s22, %s891_s23  ;;  %p897_p4 = scmp.lt.s32.totalorder %s891_s23, %s891_s23 }
 0x225   :  { %p898_p5 = por %p897_p4, %p896_p3 }
 0x227   :  { %p899_p6 = pnand %p898_p5, %p892_p2 }
 0x2dd   :  { %v602_v13 = vpop.f32.mrf.mxu1 }
 0x2de   :  { %v603_v14 = vadd.f32 %v643_v12, %v602_v13 }
 0x2df   :  { %v747_v15 = vpop.f32.mrf.mxu1 }
 0x2e0   :  { %607 = vst [vmem:[#allocation12] sm:$0xff] %v603_v14 }
 0x2e1   :  { %902 = shalt.err (!%p899_p6)
}
 0x2e2   :  { %618 = dma.vmem_to_hbm [thread:$0]  %s616_s22, 128, %s1063_s8, [#allocation5]  }
 0x2e3   :  { %917 = dma.done.wait [#allocation5], 128  }
 0x2e4   :  { %918 = vsyncadd [#allocation5], 4294967168 }
 0x2e5   :  { %919 = dma.done.wait [#allocation14], 128  }
 0x2e6   :  { %920 = vsyncadd [#allocation14], 4294967168 }
 0x2e7   :  { %635 = vsyncpa [#allocation4], 1 }
 0x2e8   :  { %636 = vsyncpa [#allocation7], 1 }
 0x2e9   :  { %637 = vsyncpa [#allocation10], 1 }
 0x2ea   :  { %638 = vsyncpa [#allocation5], 1 }
 0x2eb   :  { %639 = vsyncpa [#allocation14], 1 }

</bundles_post_ra>
